<compile_context>
chip_gen: v5e
topology: v5e:2x2
jax: 0.10.0
libtpu: 0.0.40
codegen_flags: <defaults>
</compile_context>

<pallas_src>
import jax
import jax.numpy as jnp
from jax.experimental import pallas as pl
from jax.experimental.pallas import tpu as pltpu


_HIDDEN = 128          # matches the PyTorch module's hidden_size
_N_TILE_MAX = 2048     # max lane tile for layer 3 / output (multiple of 128)


def _round_up(n, m):
    return ((n + m - 1) // m) * m


def _physical_vmem_bytes():
    try:
        return int(pltpu.get_tpu_info().vmem_capacity_bytes)
    except Exception:
        return 64 << 20  # conservative: v7x per-TensorCore VMEM


def _generator_kernel(x_ref, w1_ref, b1_ref, w2_ref, b2_ref, w3_ref, b3_ref,
                      o_ref, h2_ref):
    """Fused Linear->ReLU->Linear->ReLU->Linear->tanh for one (batch, N) tile.

    Grid is (batch_tiles, n_tiles). h1/h2 depend only on the batch tile, so
    they are computed once per batch tile (N index == 0) and kept in VMEM
    scratch (h2_ref) across the N axis; layer 3 runs every step on its own
    lane tile of w3/b3/out.
    """
    cd = w1_ref.dtype  # matmul operand dtype (bf16): MXU-native

    @pl.when(pl.program_id(1) == 0)
    def _():
        # Layer 1: Linear + ReLU (bf16 operands, explicit f32 accumulation).
        # x arrives in its native dtype; cast in-kernel (no extra HBM pass).
        h1 = jnp.dot(x_ref[...].astype(cd), w1_ref[...],
                     preferred_element_type=jnp.float32) + b1_ref[...]
        h1 = jnp.maximum(h1, 0.0)
        # Layer 2: Linear + ReLU
        h2 = jnp.dot(h1.astype(cd), w2_ref[...],
                     preferred_element_type=jnp.float32) + b2_ref[...]
        h2_ref[...] = jnp.maximum(h2, 0.0).astype(h2_ref.dtype)

    # Layer 3: Linear + tanh (tanh lowers to the EUP, off the VALU/MXU path).
    out = jnp.dot(h2_ref[...], w3_ref[...],
                  preferred_element_type=jnp.float32) + b3_ref[...]
    o_ref[...] = jnp.tanh(out).astype(o_ref.dtype)


def prepare_generator_params(params, *, compute_dtype=jnp.bfloat16):
    """Optional one-time cast of parameters (amortizes the per-call casts)."""
    out = dict(params)
    for k in ("w1", "w2", "w3"):
        out[k] = params[k].astype(compute_dtype)
    for k in ("b1", "b2", "b3"):
        out[k] = params[k].astype(jnp.float32)
    return out


def generator_forward(x, params, *, batch_tile=1024, n_tile=_N_TILE_MAX,
                      compute_dtype=jnp.bfloat16, out_dtype=jnp.bfloat16):
    """Fused 3-layer MLP Generator forward pass as one Pallas kernel.

    x:       (B, z_dim), any float dtype (streamed as-is, cast in-kernel)
    params:  dict with w1 (z_dim,H), b1 (1,H), w2 (H,H), b2 (1,H),
             w3 (H,out_dim), b3 (1,out_dim)
    returns: (B, out_dim) in `out_dtype` (default bfloat16; pass jnp.float32
             for a full-precision output buffer at 2x the writeback traffic).

    Precision policy: bf16 matmul operands, f32 accumulation / biases / tanh.
    """
    w1, b1 = params["w1"], params["b1"]
    w2, b2 = params["w2"], params["b2"]
    w3, b3 = params["w3"], params["b3"]

    B, z_dim = x.shape
    H = w1.shape[1]
    out_dim = w3.shape[1]

    # ---- output (lane) tiling: lane-dense 128-multiple stores, bounded VMEM ----
    op = _round_up(out_dim, 128)
    if op <= n_tile:
        tn = op
    else:
        tn = _round_up(n_tile, 128)
        op = _round_up(op, tn)
    nj = op // tn

    # ---- batch tiling: 16-aligned; force >=2 grid steps when B > 16 so the
    # "parallel" axis can shard across both TensorCores on v7x ----
    half = _round_up(pl.cdiv(B, 2), 16)
    tb = max(16, min(batch_tile, half))
    Bp = _round_up(B, tb)
    nb = Bp // tb

    # ---- padding / casts (weights only; x is never padded along K) ----
    if Bp != B:
        x = jnp.pad(x, ((0, Bp - B), (0, 0)))  # row pad for ragged batch only
    if op != out_dim:
        w3 = jnp.pad(w3, ((0, 0), (0, op - out_dim)))
        b3 = jnp.pad(b3, ((0, 0), (0, op - out_dim)))

    def _as(a, dt):
        return a if a.dtype == dt else a.astype(dt)

    w1c = _as(w1, compute_dtype)
    w2c = _as(w2, compute_dtype)
    w3c = _as(w3, compute_dtype)
    b1f = _as(b1.reshape(1, -1), jnp.float32)
    b2f = _as(b2.reshape(1, -1), jnp.float32)
    b3f = _as(b3.reshape(1, -1), jnp.float32)

    c_isz = jnp.dtype(compute_dtype).itemsize
    o_isz = jnp.dtype(out_dtype).itemsize
    x_isz = jnp.dtype(x.dtype).itemsize

    # ---- VMEM budget: actual tile footprint + headroom, capped sensibly ----
    est = (2 * tb * z_dim * x_isz                 # x tile (double-buffered)
           + 2 * (z_dim * H + H * H) * c_isz      # w1, w2 (resident)
           + 2 * H * tn * c_isz                   # w3 lane tile
           + 2 * (2 * H + tn) * 4                 # biases (f32)
           + 2 * tb * tn * o_isz                  # output tile
           + tb * H * c_isz                       # h2 scratch
           + tb * tn * 4 + tb * H * 4)            # f32 intermediates headroom
    cap = min(48 << 20, (_physical_vmem_bytes() * 3) // 4)
    vmem_limit = int(min(cap, max(16 << 20, est + (8 << 20))))

    cost = pl.CostEstimate(
        flops=2 * Bp * (z_dim * H + H * H + H * op),
        transcendentals=Bp * op,
        bytes_accessed=(Bp * z_dim * x_isz
                        + (z_dim * H + H * H + H * op) * c_isz
                        + (2 * H + op) * 4
                        + Bp * op * o_isz),
    )

    in_specs = [
        pl.BlockSpec((tb, z_dim), lambda i, j: (i, 0)),   # x   (streamed)
        pl.BlockSpec((z_dim, H), lambda i, j: (0, 0)),    # w1  (resident)
        pl.BlockSpec((1, H), lambda i, j: (0, 0)),        # b1
        pl.BlockSpec((H, H), lambda i, j: (0, 0)),        # w2
        pl.BlockSpec((1, H), lambda i, j: (0, 0)),        # b2
        pl.BlockSpec((H, tn), lambda i, j: (0, j)),       # w3  (lane-tiled)
        pl.BlockSpec((1, tn), lambda i, j: (0, j)),       # b3
    ]
    out_specs = pl.BlockSpec((tb, tn), lambda i, j: (i, j))

    out = pl.pallas_call(
        _generator_kernel,
        out_shape=jax.ShapeDtypeStruct((Bp, op), out_dtype),
        grid_spec=pltpu.PrefetchScalarGridSpec(
            num_scalar_prefetch=0,
            grid=(nb, nj),
            in_specs=in_specs,
            out_specs=out_specs,
            scratch_shapes=[pltpu.VMEM((tb, H), compute_dtype)],  # h2 carry
        ),
        compiler_params=pltpu.CompilerParams(
            dimension_semantics=("parallel", "arbitrary"),
            vmem_limit_bytes=vmem_limit,
        ),
        cost_estimate=cost,
    )(x, w1c, b1f, w2c, b2f, w3c, b3f)

    # Only materialize a slice when padding was actually added.
    if Bp != B or op != out_dim:
        out = out[:B, :out_dim]
    return out


def init_generator_params(key, img_shape, z_dim, hidden_size=_HIDDEN,
                          dtype=jnp.float32):
    """Deterministic synthetic parameter init (matches nn.Linear shapes)."""
    img_rows, img_cols, channels = img_shape
    out_dim = img_rows * img_cols * channels
    k1, k2, k3, k4, k5, k6 = jax.random.split(key, 6)

    def lin(kw, kb, fan_in, fan_out):
        # PyTorch nn.Linear default init: U(-1/sqrt(fan_in), 1/sqrt(fan_in))
        bound = 1.0 / jnp.sqrt(jnp.array(fan_in, dtype))
        w = jax.random.uniform(kw, (fan_in, fan_out), dtype, -bound, bound)
        b = jax.random.uniform(kb, (1, fan_out), dtype, -bound, bound)
        return w, b

    w1, b1 = lin(k1, k2, z_dim, hidden_size)
    w2, b2 = lin(k3, k4, hidden_size, hidden_size)
    w3, b3 = lin(k5, k6, hidden_size, out_dim)
    return {"w1": w1, "b1": b1, "w2": w2, "b2": b2, "w3": w3, "b3": b3}


def generator_ref(x, params, compute_dtype=jnp.bfloat16):
    """Pure-JAX reference with the same explicit mixed-precision policy."""
    cd = compute_dtype

    def mm(a, w):
        return jnp.dot(a.astype(cd), w.astype(cd),
                       preferred_element_type=jnp.float32)

    h = jnp.maximum(mm(x, params["w1"]) + params["b1"].astype(jnp.float32), 0.0)
    h = jnp.maximum(mm(h, params["w2"]) + params["b2"].astype(jnp.float32), 0.0)
    return jnp.tanh(mm(h, params["w3"]) + params["b3"].astype(jnp.float32))


if __name__ == "__main__":
    key = jax.random.PRNGKey(0)
    kx1, kp1, kx2, kp2 = jax.random.split(key, 4)

    # ---- Test 1: small shapes; K<128 streamed as-is, ragged batch, 128-pad
    # of out, bf16 output (default), pre-prepared (bf16) weights. ----
    img_shape = (7, 7, 2)     # out_dim = 98 -> padded to 128
    z_dim = 16
    batch = 10
    params = init_generator_params(kp1, img_shape, z_dim)
    x = jax.random.normal(kx1, (batch, z_dim), dtype=jnp.float32)

    out = generator_forward(x, prepare_generator_params(params))
    out = jax.block_until_ready(out)
    ref = generator_ref(x, params)

    out_dim = img_shape[0] * img_shape[1] * img_shape[2]
    assert out.shape == (batch, out_dim)
    assert out.dtype == jnp.bfloat16
    out_f32 = out.astype(jnp.float32)
    assert bool(jnp.all(jnp.isfinite(out_f32)))
    assert jnp.allclose(out_f32, ref, atol=2e-2, rtol=2e-2), "mismatch (test 1)"

    # ---- Test 2: exercises multi-step batch grid (2 tiles) and N-tiling of
    # layer 3 (out_dim=2352 -> tn=2048, 2 lane tiles), f32 output. ----
    img_shape2 = (28, 28, 3)  # out_dim = 2352
    z_dim2 = 64
    batch2 = 48
    params2 = init_generator_params(kp2, img_shape2, z_dim2)
    x2 = jax.random.normal(kx2, (batch2, z_dim2), dtype=jnp.float32)

    out2 = generator_forward(x2, params2, out_dtype=jnp.float32)
    out2 = jax.block_until_ready(out2)
    ref2 = generator_ref(x2, params2)

    out_dim2 = img_shape2[0] * img_shape2[1] * img_shape2[2]
    assert out2.shape == (batch2, out_dim2)
    assert bool(jnp.all(jnp.isfinite(out2)))
    assert jnp.allclose(out2, ref2, atol=5e-3, rtol=5e-3), "mismatch (test 2)"

    print("KERNEL_OK")
</pallas_src>

<mosaic_0001>
module attributes {stable_mosaic.version = 11 : i64} {
  func.func @_generator_kernel(%arg0: i32, %arg1: i32, %arg2: memref<16x16xf32, #tpu.memory_space<vmem>>, %arg3: memref<16x128xbf16, #tpu.memory_space<vmem>>, %arg4: memref<1x128xf32, #tpu.memory_space<vmem>>, %arg5: memref<128x128xbf16, #tpu.memory_space<vmem>>, %arg6: memref<1x128xf32, #tpu.memory_space<vmem>>, %arg7: memref<128x128xbf16, #tpu.memory_space<vmem>>, %arg8: memref<1x128xf32, #tpu.memory_space<vmem>>, %arg9: memref<16x128xbf16, #tpu.memory_space<vmem>>, %arg10: memref<16x128xbf16, #tpu.memory_space<vmem>>) attributes {dimension_semantics = [#tpu.dimension_semantics<parallel>, #tpu.dimension_semantics<arbitrary>], iteration_bounds = array<i64: 1, 1>, scalar_prefetch = 0 : i64, scratch_operands = 1 : i64, tpu.core_type = #tpu.core_type<tc>, window_params = [{transform_indices = @transform_0, window_bounds = array<i64: 16, 16>}, {pipeline_mode = #tpu.pipeline_mode<synchronous>, transform_indices = @transform_1, window_bounds = array<i64: 16, 128>}, {pipeline_mode = #tpu.pipeline_mode<synchronous>, transform_indices = @transform_2, window_bounds = array<i64: 1, 128>}, {pipeline_mode = #tpu.pipeline_mode<synchronous>, transform_indices = @transform_3, window_bounds = array<i64: 128, 128>}, {pipeline_mode = #tpu.pipeline_mode<synchronous>, transform_indices = @transform_4, window_bounds = array<i64: 1, 128>}, {transform_indices = @transform_5, window_bounds = array<i64: 128, 128>}, {transform_indices = @transform_6, window_bounds = array<i64: 1, 128>}, {transform_indices = @transform_7, window_bounds = array<i64: 16, 128>}]} {
    %c0_i32 = arith.constant 0 : i32
    %0 = arith.cmpi eq, %arg1, %c0_i32 : i32
    %1 = arith.extui %0 : i1 to i32
    %c0_i32_0 = arith.constant 0 : i32
    %2 = arith.cmpi ne, %1, %c0_i32_0 : i32
    scf.if %2 {
      %c0_8 = arith.constant 0 : index
      %c0_9 = arith.constant 0 : index
      %12 = vector.load %arg2[%c0_8, %c0_9] : memref<16x16xf32, #tpu.memory_space<vmem>>, vector<16x16xf32>
      %13 = arith.truncf %12 : vector<16x16xf32> to vector<16x16xbf16>
      %c0_10 = arith.constant 0 : index
      %c0_11 = arith.constant 0 : index
      %14 = vector.load %arg3[%c0_10, %c0_11] : memref<16x128xbf16, #tpu.memory_space<vmem>>, vector<16x128xbf16>
      %cst_12 = arith.constant dense<0.000000e+00> : vector<16x128xf32>
      %15 = tpu.matmul %13, %14, %cst_12 {dimension_numbers = #tpu.dot_dimension_numbers<[1], [0], [0], [1], [0, 0, 1, 1], [], []>} : vector<16x16xbf16>, vector<16x128xbf16>, vector<16x128xf32> -> vector<16x128xf32>
      %c0_13 = arith.constant 0 : index
      %c0_14 = arith.constant 0 : index
      %16 = vector.load %arg4[%c0_13, %c0_14] : memref<1x128xf32, #tpu.memory_space<vmem>>, vector<1x128xf32>
      %17 = vector.broadcast %16 : vector<1x128xf32> to vector<16x128xf32>
      %18 = arith.addf %15, %17 : vector<16x128xf32>
      %cst_15 = arith.constant 0.000000e+00 : f32
      %19 = vector.broadcast %cst_15 : f32 to vector<16x128xf32>
      %20 = arith.maximumf %18, %19 : vector<16x128xf32>
      %21 = arith.truncf %20 : vector<16x128xf32> to vector<16x128xbf16>
      %c0_16 = arith.constant 0 : index
      %c0_17 = arith.constant 0 : index
      %22 = vector.load %arg5[%c0_16, %c0_17] : memref<128x128xbf16, #tpu.memory_space<vmem>>, vector<128x128xbf16>
      %cst_18 = arith.constant dense<0.000000e+00> : vector<16x128xf32>
      %23 = tpu.matmul %21, %22, %cst_18 {dimension_numbers = #tpu.dot_dimension_numbers<[1], [0], [0], [1], [0, 0, 1, 1], [], []>} : vector<16x128xbf16>, vector<128x128xbf16>, vector<16x128xf32> -> vector<16x128xf32>
      %c0_19 = arith.constant 0 : index
      %c0_20 = arith.constant 0 : index
      %24 = vector.load %arg6[%c0_19, %c0_20] : memref<1x128xf32, #tpu.memory_space<vmem>>, vector<1x128xf32>
      %25 = vector.broadcast %24 : vector<1x128xf32> to vector<16x128xf32>
      %26 = arith.addf %23, %25 : vector<16x128xf32>
      %cst_21 = arith.constant 0.000000e+00 : f32
      %27 = vector.broadcast %cst_21 : f32 to vector<16x128xf32>
      %28 = arith.maximumf %26, %27 : vector<16x128xf32>
      %29 = arith.truncf %28 : vector<16x128xf32> to vector<16x128xbf16>
      %c0_22 = arith.constant 0 : index
      %c0_23 = arith.constant 0 : index
      %30 = vector.load %arg10[%c0_22, %c0_23] : memref<16x128xbf16, #tpu.memory_space<vmem>>, vector<16x128xbf16>
      tpu.vector_store %arg10[%c0_22, %c0_23], %29 {strides = array<i32>} : memref<16x128xbf16, #tpu.memory_space<vmem>>, vector<16x128xbf16>,
    } else {
    }
    %c0 = arith.constant 0 : index
    %c0_1 = arith.constant 0 : index
    %3 = vector.load %arg10[%c0, %c0_1] : memref<16x128xbf16, #tpu.memory_space<vmem>>, vector<16x128xbf16>
    %c0_2 = arith.constant 0 : index
    %c0_3 = arith.constant 0 : index
    %4 = vector.load %arg7[%c0_2, %c0_3] : memref<128x128xbf16, #tpu.memory_space<vmem>>, vector<128x128xbf16>
    %cst = arith.constant dense<0.000000e+00> : vector<16x128xf32>
    %5 = tpu.matmul %3, %4, %cst {dimension_numbers = #tpu.dot_dimension_numbers<[1], [0], [0], [1], [0, 0, 1, 1], [], []>} : vector<16x128xbf16>, vector<128x128xbf16>, vector<16x128xf32> -> vector<16x128xf32>
    %c0_4 = arith.constant 0 : index
    %c0_5 = arith.constant 0 : index
    %6 = vector.load %arg8[%c0_4, %c0_5] : memref<1x128xf32, #tpu.memory_space<vmem>>, vector<1x128xf32>
    %7 = vector.broadcast %6 : vector<1x128xf32> to vector<16x128xf32>
    %8 = arith.addf %5, %7 : vector<16x128xf32>
    %9 = math.tanh %8 : vector<16x128xf32>
    %10 = arith.truncf %9 : vector<16x128xf32> to vector<16x128xbf16>
    %c0_6 = arith.constant 0 : index
    %c0_7 = arith.constant 0 : index
    %11 = vector.load %arg9[%c0_6, %c0_7] : memref<16x128xbf16, #tpu.memory_space<vmem>>, vector<16x128xbf16>
    tpu.vector_store %arg9[%c0_6, %c0_7], %10 {strides = array<i32>} : memref<16x128xbf16, #tpu.memory_space<vmem>>, vector<16x128xbf16>,
    return
  }
  func.func @transform_0(%arg0: i32, %arg1: i32) -> (i32, i32) {
    %c0_i32 = arith.constant 0 : i32
    %c0_i32_0 = arith.constant 0 : i32
    return %arg0, %c0_i32 : i32, i32
  }
  func.func @transform_1(%arg0: i32, %arg1: i32) -> (i32, i32) {
    %c0_i32 = arith.constant 0 : i32
    %c0_i32_0 = arith.constant 0 : i32
    %c0_i32_1 = arith.constant 0 : i32
    return %c0_i32, %c0_i32_0 : i32, i32
  }
  func.func @transform_2(%arg0: i32, %arg1: i32) -> (i32, i32) {
    %c0_i32 = arith.constant 0 : i32
    %c0_i32_0 = arith.constant 0 : i32
    %c0_i32_1 = arith.constant 0 : i32
    return %c0_i32, %c0_i32_0 : i32, i32
  }
  func.func @transform_3(%arg0: i32, %arg1: i32) -> (i32, i32) {
    %c0_i32 = arith.constant 0 : i32
    %c0_i32_0 = arith.constant 0 : i32
    %c0_i32_1 = arith.constant 0 : i32
    return %c0_i32, %c0_i32_0 : i32, i32
  }
  func.func @transform_4(%arg0: i32, %arg1: i32) -> (i32, i32) {
    %c0_i32 = arith.constant 0 : i32
    %c0_i32_0 = arith.constant 0 : i32
    %c0_i32_1 = arith.constant 0 : i32
    return %c0_i32, %c0_i32_0 : i32, i32
  }
  func.func @transform_5(%arg0: i32, %arg1: i32) -> (i32, i32) {
    %c0_i32 = arith.constant 0 : i32
    %c0_i32_0 = arith.constant 0 : i32
    return %c0_i32, %arg1 : i32, i32
  }
  func.func @transform_6(%arg0: i32, %arg1: i32) -> (i32, i32) {
    %c0_i32 = arith.constant 0 : i32
    %c0_i32_0 = arith.constant 0 : i32
    return %c0_i32, %arg1 : i32, i32
  }
  func.func @transform_7(%arg0: i32, %arg1: i32) -> (i32, i32) {
    %c0_i32 = arith.constant 0 : i32
    return %arg0, %arg1 : i32, i32
  }
}

</mosaic_0001>

<bundles_post_ra>
// kernel: tpu_custom_call.1
= control target key start
LH: loop header
LB: loop body
LE: loop exit
PB: predicated region body
PF: predicated region fallthrough
CT: control target
= control target key end

     0   :  { %12 = vsyncpa [#allocation4], 0  ;;  %s666_s0 = inlined_call_operand.hbm [shape: f32[16,16], index: 0, kind: input, shape index: {}]   ;;  %s667_s1 = inlined_call_operand.hbm [shape: bf16[16,128], index: 1, kind: input, shape index: {}]   ;;  %s668_s2 = inlined_call_operand.vmem [shape: f32[1,128], index: 2, kind: input, shape index: {}]   ;;  %s669_s3 = inlined_call_operand.hbm [shape: bf16[128,128], index: 3, kind: input, shape index: {}]   ;;  %s670_s4 = inlined_call_operand.vmem [shape: f32[1,128], index: 4, kind: input, shape index: {}]   ;;  %s671_s5 = inlined_call_operand.hbm [shape: bf16[128,128], index: 5, kind: input, shape index: {}]   ;;  %s672_s6 = inlined_call_operand.vmem [shape: f32[1,128], index: 6, kind: input, shape index: {}]   ;;  %s673_s7 = inlined_call_operand.hbm [shape: bf16[16,128], index: 7, kind: output, shape index: {}]  }
   0x1   :  { %13 = vsyncpa [#allocation7], 0 }
   0x2   :  { %14 = vsyncpa [#allocation10], 0  ;;  %s33_s26 = sshll.u32 %s667_s1, 4  ;;  %s34_s26 = int_to_ptr.hbm [resolvable:$true] %s33_s26 }
   0x3   :  { %15 = vsyncpa [#allocation5], 0  ;;  %s581_s27 = smov [#allocation6]   ;;  %s20_s8 = sshll.u32 %s666_s0, 4  ;;  %s21_s8 = int_to_ptr.hbm [resolvable:$true] %s20_s8 }
   0x4   :  { %s35_s28 = sshll.u32 %s581_s27, 4  ;;  %s582_s9 = smov 64   ;;  %s36_s28 = int_to_ptr.vmem [resolvable:$true] %s35_s28 }
   0x5   :  { %s583_s10 = smov 4   ;;  %s584_s11 = smov [#allocation3]  }
   0x6   :  { %41 = dma.hbm_to_vmem [thread:$0]  %s34_s26, 128, %s36_s28, [#allocation7], %s582_s9, %s582_s9, %s583_s10  }
   0x7   :  { %s22_s12 = sshll.u32 %s584_s11, 4  ;;  %s585_s1 = smov 128   ;;  %s23_s12 = int_to_ptr.vmem [resolvable:$true] %s22_s12 }
   0x8   :  { %s586_s13 = smov 8   ;;  %s48_s16 = sshll.u32 %s669_s3, 4  ;;  %s49_s16 = int_to_ptr.hbm [resolvable:$true] %s48_s16 }
   0x9   :  { %28 = dma.hbm_to_vmem [thread:$0]  %s21_s8, 256, %s23_s12, [#allocation4], %s585_s1, %s585_s1, %s586_s13  }
   0xa   :  { %s587_s17 = smov [#allocation8]   ;;  %s63_s20 = sshll.u32 %s671_s5, 4  ;;  %s64_s20 = int_to_ptr.hbm [resolvable:$true] %s63_s20 }
   0xb   :  { %s50_s0 = sshll.u32 %s587_s17, 4  ;;  %s588_s21 = smov [#allocation9]   ;;  %s51_s0 = int_to_ptr.vmem [resolvable:$true] %s50_s0 }
   0xc   :  { %56 = dma.hbm_to_vmem [thread:$0]  %s49_s16, 1024, %s51_s0, [#allocation7], %s582_s9, %s582_s9, %s583_s10  }
   0xd   :  { %s65_s22 = sshll.u32 %s588_s21, 4  ;;  %s66_s22 = int_to_ptr.vmem [resolvable:$true] %s65_s22 }
   0xe   :  { %71 = dma.hbm_to_vmem [thread:$0]  %s64_s20, 1024, %s66_s22, [#allocation10], %s582_s9, %s582_s9, %s583_s10  }
   0xf   :  { %573 = dma.done.wait [#allocation4], 256  }
  0x10   :  { %574 = vsyncadd [#allocation4], 4294967040 }
  0x11   :  { %575 = dma.done.wait [#allocation7], 1152  }
  0x12   :  { %576 = vsyncadd [#allocation7], 4294966144 }
  0x13   :  { %577 = dma.done.wait [#allocation10], 1024  }
  0x14   :  { %578 = vsyncadd [#allocation10], 4294966272  ;;  %v409_v0 = vld [vmem:[#allocation6] sm:$0xff]  ;;  %v95_v1 = vld [vmem:[#allocation3] sm:$0xff]  ;;  %vm110_vm0 = vcmask 130048   ;;  %s321_s29 = sshll.u32 %s673_s7, 4  ;;  %s322_s29 = int_to_ptr.hbm [resolvable:$true] %s321_s29 }
  0x15   :  { %v96_v2 = vld [vmem:[#allocation3 + $0x8] sm:$0xff]  ;;  %v417_v4 = vld [vmem:[#allocation8 + $0x38] sm:$0xff]  ;;  %121 = vmatpush.bf16.msra.mxu0 %v409_v0  ;;  %v415_v6 = vld [vmem:[#allocation8 + $0x28] sm:$0xff] }
  0x16   :  { %v97_v3 = vpack.c.bf16 %v96_v2, %v95_v1  ;;  %199 = vmatpush.bf16.msra.mxu1 %v417_v4  ;;  %v416_v5 = vld [vmem:[#allocation8 + $0x30] sm:$0xff]  ;;  %v414_v7 = vld [vmem:[#allocation8 + $0x20] sm:$0xff]  ;;  %v413_v8 = vld [vmem:[#allocation8 + $0x18] sm:$0xff] }
  0x17   :  { %v412_v9 = vld [vmem:[#allocation8 + $0x10] sm:$0xff]  ;;  %v411_v10 = vld [vmem:[#allocation8 + $0x8] sm:$0xff]  ;;  %v410_v11 = vld [vmem:[#allocation8] sm:$0xff] }
  0x18   :  { %340 = vmatmul.msk.bf16.vlgmr.msra.gmra.mxu0 %vm110_vm0, %v97_v3  ;;  %v426_v12 = vld [vmem:[#allocation9 + $0x38] sm:$0xff]  ;;  %v425_v13 = vld [vmem:[#allocation9 + $0x30] sm:$0xff]  ;;  %v446_v15 = vld [vmem:[%s668_s2] ss:$0 sm:$0xff] }
  0x19   :  { %295 = vmatpush.bf16.msra.mxu2 %v426_v12  ;;  %v424_v22 = vld [vmem:[#allocation9 + $0x28] sm:$0xff]  ;;  %v423_v23 = vld [vmem:[#allocation9 + $0x20] sm:$0xff]  ;;  %v422_v24 = vld [vmem:[#allocation9 + $0x18] sm:$0xff] }
  0x1a   :  { %200 = vmatpush.bf16.msra.mxu1 %v416_v5  ;;  %v421_v25 = vld [vmem:[#allocation9 + $0x10] sm:$0xff]  ;;  %v420_v26 = vld [vmem:[#allocation9 + $0x8] sm:$0xff]  ;;  %v419_v27 = vld [vmem:[#allocation9] sm:$0xff] }
  0x1b   :  { %v447_v29 = vld [vmem:[%s670_s4] ss:$0 sm:$0xff]  ;;  %s589_s4 = smov [#allocation11]  }
  0x1c   :  { %v448_v38 = vld [vmem:[%s672_s6] ss:$0 sm:$0xff]  ;;  %s319_s26 = sshll.u32 %s589_s4, 4  ;;  %s320_s26 = int_to_ptr.vmem [resolvable:$true] %s319_s26 }
  0x1d   :  { %296 = vmatpush.bf16.msra.mxu2 %v425_v13 }
  0x1e   :  { %201 = vmatpush.bf16.msra.mxu1 %v415_v6 }
  0x21   :  { %297 = vmatpush.bf16.msra.mxu2 %v424_v22 }
  0x22   :  { %202 = vmatpush.bf16.msra.mxu1 %v414_v7 }
  0x25   :  { %298 = vmatpush.bf16.msra.mxu2 %v423_v23 }
  0x26   :  { %203 = vmatpush.bf16.msra.mxu1 %v413_v8 }
  0x29   :  { %299 = vmatpush.bf16.msra.mxu2 %v422_v24 }
  0x2a   :  { %204 = vmatpush.bf16.msra.mxu1 %v412_v9 }
  0x2d   :  { %300 = vmatpush.bf16.msra.mxu2 %v421_v25 }
  0x2e   :  { %205 = vmatpush.bf16.msra.mxu1 %v411_v10 }
  0x31   :  { %301 = vmatpush.bf16.msra.mxu2 %v420_v26 }
  0x32   :  { %206 = vmatpush.bf16.msra.mxu1 %v410_v11 }
  0x35   :  { %302 = vmatpush.bf16.msra.mxu2 %v419_v27 }
  0x95   :  { %v123_v14 = vpop.f32.mrf.mxu0 }
  0x96   :  { %v124_v16 = vadd.f32 %v446_v15, %v123_v14 }
  0x98   :  { %v128_v19 = vmax.f32 %v124_v16, 0.0 }
  0x9d   :  { %v125_v17 = vpop.f32.mrf.mxu0 }
  0x9e   :  { %v126_v18 = vadd.f32 %v446_v15, %v125_v17 }
  0xa0   :  { %v129_v20 = vmax.f32 %v126_v18, 0.0 }
  0xa2   :  { %v130_v21 = vpack.c.bf16 %v129_v20, %v128_v19 }
  0xa4   :  { %207 = vmatmul.bf16.vlgmr.msra.gmra.mxu1 %v130_v21 }
 0x121   :  { %v208_v28 = vpop.f32.mrf.mxu1 }
 0x122   :  { %v209_v30 = vadd.f32 %v447_v29, %v208_v28 }
 0x124   :  { %v213_v33 = vmax.f32 %v209_v30, 0.0 }
 0x129   :  { %v210_v31 = vpop.f32.mrf.mxu1 }
 0x12a   :  { %v211_v32 = vadd.f32 %v447_v29, %v210_v31 }
 0x12c   :  { %v214_v34 = vmax.f32 %v211_v32, 0.0 }
 0x12e   :  { %v430_v35 = vpack.c.bf16 %v214_v34, %v213_v33 }
 0x130   :  { %431 = vst [vmem:[#allocation2] sm:$0xff] %v430_v35  }
 0x137   :  { %v418_v36 = vld [vmem:[#allocation2] sm:$0xff] }
 0x138   :  { %303 = vmatmul.bf16.vlgmr.msra.gmra.mxu2 %v418_v36 }
 0x1bb   :  { %v304_v37 = vpop.f32.mrf.mxu2 }
 0x1bc   :  { %v305_v39 = vadd.f32 %v448_v38, %v304_v37 }
 0x1be   :  { %449 = vtanh.f32 %v305_v39 }
 0x1c3   :  { %v306_v40 = vpop.f32.mrf.mxu2 }
 0x1c4   :  { %v307_v41 = vadd.f32 %v448_v38, %v306_v40  ;;  %v450_v42 = vpop.eup %449 }
 0x1c6   :  { %451 = vtanh.f32 %v307_v41 }
 0x1cc   :  { %v452_v43 = vpop.eup %451 }
 0x1cd   :  { %v435_v44 = vpack.c.bf16 %v452_v43, %v450_v42 }
 0x1cf   :  { %436 = vst [vmem:[#allocation11] sm:$0xff] %v435_v44  }
 0x1d0   :  { %327 = dma.vmem_to_hbm [thread:$0]  %s320_s26, 128, %s322_s29, [#allocation5], %s582_s9, %s582_s9, %s583_s10  }
 0x1d1   :  { %579 = dma.done.wait [#allocation5], 128  }
 0x1d2   :  { %580 = vsyncadd [#allocation5], 4294967168 }
 0x1d3   :  { %332 = vsyncpa [#allocation4], 1 }
 0x1d4   :  { %333 = vsyncpa [#allocation7], 1 }
 0x1d5   :  { %334 = vsyncpa [#allocation10], 1 }
 0x1d6   :  { %335 = vsyncpa [#allocation5], 1 }

</bundles_post_ra>
